<compile_context>
chip_gen: v5e
topology: v5e:2x2
jax: 0.10.0
libtpu: 0.0.40
codegen_flags: <defaults>
</compile_context>

<pallas_src>
import functools

import jax
import jax.numpy as jnp
from jax import lax
from jax.experimental import pallas as pl
from jax.experimental.pallas import tpu as pltpu

_DEFAULT_BLOCK_BYTES = 4 * 1024 * 1024   # per-operand block budget (double-buffered)
_VMEM_LIMIT_BYTES = 32 * 1024 * 1024     # safe on v5e / v6e / v7x
_MIN_GRID = 4                            # keep >= 4 grid steps so v7x's 2 TCs are both fed

_ALPHA = 0.055
_GAMMA = 1.0 / 2.4


# ----------------------------------------------------------------------------------
# tiling helpers
# ----------------------------------------------------------------------------------
def _cdiv(a, b):
    return -(-a // b)


def _largest_divisor_leq(n, cap):
    cap = max(1, min(cap, n))
    for d in range(cap, 0, -1):
        if n % d == 0:
            return d
    return 1


def _plan_tiles(bc, h, w, itemsize, block_bytes, min_grid):
    """Pick (TB, TH, n_b, n_h) for a (bc, h, w) array: batch tile + row tile."""
    row_bytes = w * itemsize
    if h * row_bytes <= block_bytes or h <= 8:
        th = h                                                   # whole plane per block
    else:
        th = max(8, min(h, block_bytes // row_bytes) // 8 * 8)   # multiple of 8 rows
    n_h = _cdiv(h, th)
    tb_budget = max(1, block_bytes // (th * row_bytes))
    need_b = max(1, _cdiv(min_grid, n_h))                        # batch tiles for >= min_grid steps
    tb_par = max(1, bc // need_b)
    tb = _largest_divisor_leq(bc, min(tb_budget, tb_par))
    return tb, th, bc // tb, n_h


def _compiler_params(n_axes):
    return pltpu.CompilerParams(dimension_semantics=("parallel",) * n_axes,
                                vmem_limit_bytes=_VMEM_LIMIT_BYTES)


def _grad_cost(n, itemsize, l1, extra_bytes=0):
    return pl.CostEstimate(flops=int(6 * n),
                           transcendentals=0 if l1 else int(n),
                           bytes_accessed=int(2 * n * itemsize + extra_bytes))


# ----------------------------------------------------------------------------------
# in-kernel math helpers (shared by all kernels)
# ----------------------------------------------------------------------------------
def _combine(dx, dy, l1):
    if l1:
        return jnp.abs(dx) + jnp.abs(dy)
    return jnp.sqrt(dx * dx + dy * dy)


def _gamma_val(x):
    # gammaCorrection: x<=0.0031308 -> 12.92*x ; else (1+a)*(x+0.001)^(1/2.4) - a
    lin = x * 12.92
    nonlin = (1.0 + _ALPHA) * jnp.exp(_GAMMA * jnp.log(x + 0.001)) - _ALPHA
    return jnp.where(x <= 0.0031308, lin, nonlin)


def _grad_combine(x, l1):
    """TensorGradient on a resident (..., H, W) plane: zero-padded left/top difference."""
    nd = x.ndim
    mshape = (1,) * (nd - 2) + x.shape[-2:]                      # O(H*W) masks, broadcast
    col = lax.broadcasted_iota(jnp.int32, mshape, nd - 1)
    row = lax.broadcasted_iota(jnp.int32, mshape, nd - 2)
    x_l = jnp.where(col >= 1, pltpu.roll(x, shift=1, axis=nd - 1), 0.0)   # img[i, j-1]
    x_u = jnp.where(row >= 1, pltpu.roll(x, shift=1, axis=nd - 2), 0.0)   # img[i-1, j]
    return _combine(x_l - x, x_u - x, l1)


# ----------------------------------------------------------------------------------
# kernels
# ----------------------------------------------------------------------------------
def _grad2d_kernel(x_ref, o_ref, *, l1):
    # x_ref: (TB, H, W) -- whole image plane resident, no halo needed.
    o_ref[...] = _grad_combine(x_ref[...], l1).astype(o_ref.dtype)


def _grad2d_halo_kernel(x_ref, halo_ref, o_ref, *, l1):
    # x_ref: (TB, TH, W) rows [h*TH, h*TH+TH); halo_ref: (TB, 8, W) rows [h*TH-8, h*TH)
    # (clamped to block 0 when h == 0, in which case the halo value is masked away).
    x = x_ref[...]
    _, th, w = x.shape
    hh = pl.program_id(1)
    col = lax.broadcasted_iota(jnp.int32, (1, th, w), 2)
    row = lax.broadcasted_iota(jnp.int32, (1, th, w), 1)
    grow = row + hh * th                                           # global row index
    x_l = jnp.where(col >= 1, pltpu.roll(x, shift=1, axis=2), 0.0)
    prev = halo_ref[:, 7:8, :]                                     # global row h*TH - 1 (h > 0)
    x_u = jnp.where(row >= 1, pltpu.roll(x, shift=1, axis=1), prev)
    x_u = jnp.where(grow >= 1, x_u, 0.0)                           # zero-pad above image top
    o_ref[...] = _combine(x_l - x, x_u - x, l1).astype(o_ref.dtype)


def _grad_flat_kernel(x_ref, mdx_ref, mdy_ref, o_ref, *, l1, w):
    # x_ref: (1, TB, H*W) -- each image flattened to one lane-dense row.
    x = x_ref[...]
    keep_dx = mdx_ref[...] != 0        # (1, 1, H*W): flattened column index >= 1
    keep_dy = mdy_ref[...] != 0        # (1, 1, H*W): flattened row index >= 1
    x_l = jnp.where(keep_dx, pltpu.roll(x, shift=1, axis=2), 0.0)
    x_u = jnp.where(keep_dy, pltpu.roll(x, shift=w, axis=2), 0.0)
    o_ref[...] = _combine(x_l - x, x_u - x, l1).astype(o_ref.dtype)


def _gamma_kernel(x_ref, o_ref):
    o_ref[...] = _gamma_val(x_ref[...]).astype(o_ref.dtype)


def _fused_loss_kernel(x_ref, y_ref, l1_ref, l2_ref, *, l1_grad, apply_gamma):
    # x_ref: (TN, 1, H, W) prediction frames (burst index si), y_ref: (TN, 1, H, W) gt.
    # Accumulates sum |grad(g(x)) - grad(g(y))| and sum (g(x) - g(y))^2 over the burst axis.
    si = pl.program_id(1)
    tn, _, h, w = x_ref.shape
    x = x_ref[...].reshape(tn, h, w).astype(jnp.float32)
    y = y_ref[...].reshape(tn, h, w).astype(jnp.float32)
    if apply_gamma:
        x = _gamma_val(x)
        y = _gamma_val(y)
    gx = _grad_combine(x, l1_grad)
    gy = _grad_combine(y, l1_grad)
    d = x - y
    l1_part = jnp.sum(jnp.abs(gx - gy), axis=(0, 1, 2), keepdims=True)   # (1, 1, 1)
    l2_part = jnp.sum(d * d, axis=(0, 1, 2), keepdims=True)              # (1, 1, 1)

    @pl.when(si == 0)
    def _():
        l1_ref[...] = jnp.zeros_like(l1_ref)
        l2_ref[...] = jnp.zeros_like(l2_ref)

    l1_ref[...] += l1_part
    l2_ref[...] += l2_part


# ----------------------------------------------------------------------------------
# standalone op wrappers (TensorGradient / gammaCorrection)
# ----------------------------------------------------------------------------------
def _tensor_gradient_flat(x, l1, block_bytes, min_grid):
    bc, h, w = x.shape
    ell = h * w
    itemsize = jnp.dtype(x.dtype).itemsize
    tb_budget = max(1, block_bytes // (ell * itemsize))
    tb_par = max(1, bc // min_grid)
    tb = _largest_divisor_leq(bc, min(tb_budget, tb_par))
    n_b = bc // tb

    k = jnp.arange(ell, dtype=jnp.int32)
    mdx = ((k % w) >= 1).astype(jnp.int32).reshape(1, 1, ell)
    mdy = (k >= w).astype(jnp.int32).reshape(1, 1, ell)

    out = pl.pallas_call(
        functools.partial(_grad_flat_kernel, l1=l1, w=w),
        out_shape=jax.ShapeDtypeStruct((n_b, tb, ell), x.dtype),
        grid_spec=pltpu.PrefetchScalarGridSpec(
            num_scalar_prefetch=0,
            grid=(n_b,),
            in_specs=[pl.BlockSpec((1, tb, ell), lambda b: (b, 0, 0)),
                      pl.BlockSpec((1, 1, ell), lambda b: (0, 0, 0)),
                      pl.BlockSpec((1, 1, ell), lambda b: (0, 0, 0))],
            out_specs=pl.BlockSpec((1, tb, ell), lambda b: (b, 0, 0)),
        ),
        compiler_params=_compiler_params(1),
        cost_estimate=_grad_cost(bc * ell, itemsize, l1, extra_bytes=8 * ell),
    )(x.reshape(n_b, tb, ell), mdx, mdy)
    return out.reshape(bc, h, w)


def _tensor_gradient_2d(x, l1, block_bytes, min_grid):
    bc, h, w = x.shape
    itemsize = jnp.dtype(x.dtype).itemsize
    tb, th, n_b, n_h = _plan_tiles(bc, h, w, itemsize, block_bytes, min_grid)
    tiled = th < h

    x_spec = pl.BlockSpec((tb, th, w), lambda b, hh: (b, hh, 0))
    o_spec = pl.BlockSpec((tb, th, w), lambda b, hh: (b, hh, 0))

    if tiled:
        th8 = th // 8   # halo = 8-row block whose last row is the row just above this tile
        halo_spec = pl.BlockSpec((tb, 8, w),
                                 lambda b, hh: (b, jnp.maximum(hh * th8 - 1, 0), 0))
        kernel = functools.partial(_grad2d_halo_kernel, l1=l1)
        in_specs = [x_spec, halo_spec]
        operands = (x, x)
    else:
        kernel = functools.partial(_grad2d_kernel, l1=l1)
        in_specs = [x_spec]
        operands = (x,)

    return pl.pallas_call(
        kernel,
        out_shape=jax.ShapeDtypeStruct((bc, h, w), x.dtype),
        grid_spec=pltpu.PrefetchScalarGridSpec(
            num_scalar_prefetch=0,
            grid=(n_b, n_h),
            in_specs=in_specs,
            out_specs=o_spec,
        ),
        compiler_params=_compiler_params(2),
        cost_estimate=_grad_cost(bc * h * w, itemsize, l1),
    )(*operands)


def tensor_gradient(img, l1=True, *, block_bytes=_DEFAULT_BLOCK_BYTES, min_grid=_MIN_GRID):
    """Pallas TensorGradient.forward for any (..., H, W) input."""
    orig_shape = img.shape
    h, w = orig_shape[-2], orig_shape[-1]
    x = img.reshape(-1, h, w)
    itemsize = jnp.dtype(img.dtype).itemsize
    if (w % 128 != 0) and ((h * w) % 128 == 0) and (h * w * itemsize <= block_bytes):
        out = _tensor_gradient_flat(x, l1, block_bytes, min_grid)    # lane-dense stores
    else:
        out = _tensor_gradient_2d(x, l1, block_bytes, min_grid)      # (+ H-tiling halo)
    return out.reshape(orig_shape)


def gamma_correction(img, *, block_bytes=_DEFAULT_BLOCK_BYTES, min_grid=_MIN_GRID):
    """Pallas gammaCorrection (elementwise) for any (..., H, W) input."""
    orig_shape = img.shape
    h, w = orig_shape[-2], orig_shape[-1]
    x = img.reshape(-1, h, w)
    bc = x.shape[0]
    itemsize = jnp.dtype(img.dtype).itemsize
    tb, th, n_b, n_h = _plan_tiles(bc, h, w, itemsize, block_bytes, min_grid)
    n = bc * h * w
    out = pl.pallas_call(
        _gamma_kernel,
        out_shape=jax.ShapeDtypeStruct(x.shape, x.dtype),
        grid_spec=pltpu.PrefetchScalarGridSpec(
            num_scalar_prefetch=0,
            grid=(n_b, n_h),
            in_specs=[pl.BlockSpec((tb, th, w), lambda b, hh: (b, hh, 0))],
            out_specs=pl.BlockSpec((tb, th, w), lambda b, hh: (b, hh, 0)),
        ),
        compiler_params=_compiler_params(2),
        cost_estimate=pl.CostEstimate(flops=int(4 * n), transcendentals=int(2 * n),
                                      bytes_accessed=int(2 * n * itemsize)),
    )(x)
    return out.reshape(orig_shape)


# ----------------------------------------------------------------------------------
# fused loss wrapper
# ----------------------------------------------------------------------------------
def _fused_loss_sums(x, y, *, apply_gamma, l1_grad,
                     block_bytes=_DEFAULT_BLOCK_BYTES, min_grid=_MIN_GRID):
    """x: (N, S, H, W) predictions, y: (N, 1, H, W) gt.  Returns
    (sum |grad(g(x)) - grad(g(y))| , sum (g(x) - g(y))^2) over all N*S*H*W elements."""
    n, s, h, w = x.shape
    itemsize = jnp.dtype(x.dtype).itemsize
    plane_bytes = h * w * itemsize
    tn_budget = max(1, block_bytes // plane_bytes)
    need_n_tiles = max(1, _cdiv(min_grid, s))                     # grid steps for both TCs
    tn_par = max(1, n // need_n_tiles)
    tn = _largest_divisor_leq(n, min(tn_budget, tn_par))
    n_b = n // tn

    elems = x.size
    kernel = functools.partial(_fused_loss_kernel, l1_grad=l1_grad, apply_gamma=apply_gamma)
    l1_out, l2_out = pl.pallas_call(
        kernel,
        out_shape=(jax.ShapeDtypeStruct((n_b, 1, 1), jnp.float32),
                   jax.ShapeDtypeStruct((n_b, 1, 1), jnp.float32)),
        grid_spec=pltpu.PrefetchScalarGridSpec(
            num_scalar_prefetch=0,
            grid=(n_b, s),
            in_specs=[pl.BlockSpec((tn, 1, h, w), lambda nb, si: (nb, si, 0, 0)),
                      # gt block index ignores the burst axis -> stays resident, no re-DMA
                      pl.BlockSpec((tn, 1, h, w), lambda nb, si: (nb, 0, 0, 0))],
            out_specs=(pl.BlockSpec((1, 1, 1), lambda nb, si: (nb, 0, 0)),
                       pl.BlockSpec((1, 1, 1), lambda nb, si: (nb, 0, 0))),
        ),
        compiler_params=pltpu.CompilerParams(
            dimension_semantics=("parallel", "arbitrary"),
            vmem_limit_bytes=_VMEM_LIMIT_BYTES),
        cost_estimate=pl.CostEstimate(
            flops=int(24 * elems),
            transcendentals=int(4 * elems) if apply_gamma else 0,
            bytes_accessed=int((elems + n * h * w) * itemsize + 8 * n_b)),
    )(x, y)
    return jnp.sum(l1_out), jnp.sum(l2_out)


def _fused_ok(x, y, block_bytes):
    if x.ndim != 4 or y.ndim != 4:
        return False
    if y.shape[1] != 1 or x.shape[0] != y.shape[0] or x.shape[2:] != y.shape[2:]:
        return False
    plane_bytes = x.shape[-2] * x.shape[-1] * jnp.dtype(x.dtype).itemsize
    return plane_bytes <= block_bytes


def _pair_loss_mean(x, y, *, apply_gamma, l1_grad=True,
                    fused_block_bytes=_DEFAULT_BLOCK_BYTES):
    """mean |grad(x) - grad(y)| + mean (x - y)^2 over x's elements (y broadcast over the
    burst axis), optionally applying gammaCorrection to both inputs first."""
    if _fused_ok(x, y, fused_block_bytes):
        l1s, l2s = _fused_loss_sums(x, y, apply_gamma=apply_gamma, l1_grad=l1_grad,
                                    block_bytes=fused_block_bytes)
        return (l1s + l2s) / x.size
    # Fallback: separate Pallas kernels (+ H-tiling halo for huge frames), batched over the
    # burst axis so grad(gt) / gamma(gt) are computed only once, means in plain JAX.
    if apply_gamma:
        x = gamma_correction(x)
        y = gamma_correction(y)
    gx = tensor_gradient(x, l1=l1_grad)
    gy = tensor_gradient(y, l1=l1_grad)
    return jnp.mean(jnp.abs(gx - gy)) + jnp.mean((x - y) ** 2)


# ----------------------------------------------------------------------------------
# loss composition (matches the PyTorch module forward)
# ----------------------------------------------------------------------------------
def basic_loss(pred, gt, *, fused_block_bytes=_DEFAULT_BLOCK_BYTES):
    """BasicLoss.forward (no gamma): L1(grad(pred), grad(gt)) + MSE(pred, gt)."""
    return _pair_loss_mean(pred, gt, apply_gamma=False, fused_block_bytes=fused_block_bytes)


def anneal_loss(step, preds, gt, ita=100.0, gama=0.9998, *,
                fused_block_bytes=_DEFAULT_BLOCK_BYTES):
    """AnnealLoss.forward (no gamma). The per-burst loop is folded into one batched mean
    (each term averages the same element count, so the fold is exact)."""
    core = _pair_loss_mean(preds, gt, apply_gamma=False, fused_block_bytes=fused_block_bytes)
    return ita * (gama ** step) * core


def total_loss(pred, preds, gt, step, ita=100.0, gama=0.9998, *,
               fused_block_bytes=_DEFAULT_BLOCK_BYTES):
    """totalLoss.forward: gammaCorrection is fused into the loss kernels."""
    base = _pair_loss_mean(pred, gt, apply_gamma=True, fused_block_bytes=fused_block_bytes)
    core = _pair_loss_mean(preds, gt, apply_gamma=True, fused_block_bytes=fused_block_bytes)
    return base, ita * (gama ** step) * core


# ----------------------------------------------------------------------------------
# pure-JAX references (mirror the PyTorch forward) for verification
# ----------------------------------------------------------------------------------
def _grad_reference(img, l1=True):
    h, w = img.shape[-2], img.shape[-1]
    nb = img.ndim - 2
    x_l = jnp.pad(img, [(0, 0)] * nb + [(0, 0), (1, 0)])[..., :, :w]
    x_u = jnp.pad(img, [(0, 0)] * nb + [(1, 0), (0, 0)])[..., :h, :]
    dx = x_l - img
    dy = x_u - img
    if l1:
        return jnp.abs(dx) + jnp.abs(dy)
    return jnp.sqrt(dx ** 2 + dy ** 2)


def _gamma_reference(x):
    return jnp.where(x <= 0.0031308, x * 12.92,
                     (1.0 + _ALPHA) * jnp.power(x + 0.001, _GAMMA) - _ALPHA)


def _basic_loss_reference(pred, gt):
    return (jnp.mean(jnp.abs(_grad_reference(pred) - _grad_reference(gt)))
            + jnp.mean((pred - gt) ** 2))


def _total_loss_reference(pred, preds, gt, step, ita=100.0, gama=0.9998):
    pred = _gamma_reference(pred)
    gt = _gamma_reference(gt)
    preds = _gamma_reference(preds)
    base = _basic_loss_reference(pred, gt)
    s = preds.shape[1]
    acc = 0.0
    for i in range(s):
        acc = acc + _basic_loss_reference(preds[:, i][:, None, ...], gt)
    return base, ita * (gama ** step) * (acc / s)


# ----------------------------------------------------------------------------------
if __name__ == "__main__":
    key = jax.random.PRNGKey(0)
    kp, kb, kg, k1, k2 = jax.random.split(key, 5)

    # totalLoss inputs: pred/gt are (N, 1, H, W) frames, preds is the (N, burst, H, W) stack.
    pred = jax.random.uniform(kp, (2, 1, 16, 16), dtype=jnp.float32)
    preds = jax.random.uniform(kb, (2, 4, 16, 16), dtype=jnp.float32)
    gt = jax.random.uniform(kg, (2, 1, 16, 16), dtype=jnp.float32)
    step = 100

    # --- gradient kernel: lane-dense flattened path (W=16, H*W=256) ---------------
    xa = jax.random.normal(k1, (2, 4, 16, 16), dtype=jnp.float32)
    for use_l1 in (True, False):
        got = jax.block_until_ready(tensor_gradient(xa, l1=use_l1))
        assert got.shape == xa.shape and got.dtype == xa.dtype
        assert jnp.allclose(got, _grad_reference(xa, use_l1), atol=1e-5, rtol=1e-5)

    # --- gradient kernel: 2-D path with TB>1 batching (W already lane-dense) ------
    xb = jax.random.normal(k2, (2, 4, 16, 128), dtype=jnp.float32)
    assert jnp.allclose(tensor_gradient(xb, l1=True), _grad_reference(xb, True),
                        atol=1e-5, rtol=1e-5)

    # --- gradient kernel: H-tiled halo path (tiny budget forces TH=16 < H=32) -----
    xc = jax.random.normal(k1, (1, 2, 32, 128), dtype=jnp.float32)
    for use_l1 in (True, False):
        got = tensor_gradient(xc, l1=use_l1, block_bytes=8 * 1024)
        assert jnp.allclose(got, _grad_reference(xc, use_l1), atol=1e-5, rtol=1e-5)

    # --- gradient kernel: odd-shape fallback (neither W nor H*W multiple of 128) --
    xd = jax.random.normal(k2, (2, 2, 10, 10), dtype=jnp.float32)
    assert jnp.allclose(tensor_gradient(xd, l1=True), _grad_reference(xd, True),
                        atol=1e-5, rtol=1e-5)

    # --- gammaCorrection kernel ----------------------------------------------------
    gc = jax.block_until_ready(gamma_correction(preds))
    assert jnp.allclose(gc, _gamma_reference(preds), atol=1e-5, rtol=1e-5)

    # --- fused BasicLoss / AnnealLoss (no gamma) vs looped reference ---------------
    bl = jax.block_until_ready(basic_loss(pred, gt))
    assert jnp.allclose(bl, _basic_loss_reference(pred, gt), atol=1e-5, rtol=1e-4)
    al = jax.block_until_ready(anneal_loss(step, preds, gt))
    acc = 0.0
    for i in range(preds.shape[1]):
        acc = acc + _basic_loss_reference(preds[:, i][:, None, ...], gt)
    ref_al = 100.0 * (0.9998 ** step) * (acc / preds.shape[1])
    assert jnp.allclose(al, ref_al, atol=1e-4, rtol=1e-4)

    # --- full totalLoss forward: fused path -----------------------------------------
    base_l, anneal_l = total_loss(pred, preds, gt, step)
    base_l.block_until_ready()
    anneal_l.block_until_ready()
    ref_base, ref_anneal = _total_loss_reference(pred, preds, gt, step)
    assert jnp.allclose(base_l, ref_base, atol=1e-5, rtol=1e-4)
    assert jnp.allclose(anneal_l, ref_anneal, atol=1e-4, rtol=1e-4)

    # --- full totalLoss forward: forced unfused fallback path -----------------------
    base_f, anneal_f = total_loss(pred, preds, gt, step, fused_block_bytes=1)
    base_f.block_until_ready()
    anneal_f.block_until_ready()
    assert jnp.allclose(base_f, ref_base, atol=1e-5, rtol=1e-4)
    assert jnp.allclose(anneal_f, ref_anneal, atol=1e-4, rtol=1e-4)

    print("KERNEL_OK")
</pallas_src>

<mosaic_0001>
module attributes {stable_mosaic.version = 11 : i64} {
  func.func @_grad_flat_kernel(%arg0: i32, %arg1: memref<1x2x256xf32, #tpu.memory_space<vmem>>, %arg2: memref<1x1x256xi32, #tpu.memory_space<vmem>>, %arg3: memref<1x1x256xi32, #tpu.memory_space<vmem>>, %arg4: memref<1x2x256xf32, #tpu.memory_space<vmem>>) attributes {dimension_semantics = [#tpu.dimension_semantics<parallel>], iteration_bounds = array<i64: 4>, scalar_prefetch = 0 : i64, scratch_operands = 0 : i64, tpu.core_type = #tpu.core_type<tc>, window_params = [{transform_indices = @transform_0, window_bounds = array<i64: 1, 2, 256>}, {pipeline_mode = #tpu.pipeline_mode<synchronous>, transform_indices = @transform_1, window_bounds = array<i64: 1, 1, 256>}, {pipeline_mode = #tpu.pipeline_mode<synchronous>, transform_indices = @transform_2, window_bounds = array<i64: 1, 1, 256>}, {transform_indices = @transform_3, window_bounds = array<i64: 1, 2, 256>}]} {
    %c0 = arith.constant 0 : index
    %c0_0 = arith.constant 0 : index
    %c0_1 = arith.constant 0 : index
    %0 = vector.load %arg1[%c0, %c0_0, %c0_1] : memref<1x2x256xf32, #tpu.memory_space<vmem>>, vector<1x2x256xf32>
    %c0_2 = arith.constant 0 : index
    %c0_3 = arith.constant 0 : index
    %c0_4 = arith.constant 0 : index
    %1 = vector.load %arg2[%c0_2, %c0_3, %c0_4] : memref<1x1x256xi32, #tpu.memory_space<vmem>>, vector<1x1x256xi32>
    %c0_i32 = arith.constant 0 : i32
    %2 = vector.broadcast %c0_i32 : i32 to vector<1x1x256xi32>
    %3 = arith.cmpi ne, %1, %2 : vector<1x1x256xi32>
    %c0_5 = arith.constant 0 : index
    %c0_6 = arith.constant 0 : index
    %c0_7 = arith.constant 0 : index
    %4 = vector.load %arg3[%c0_5, %c0_6, %c0_7] : memref<1x1x256xi32, #tpu.memory_space<vmem>>, vector<1x1x256xi32>
    %c0_i32_8 = arith.constant 0 : i32
    %5 = vector.broadcast %c0_i32_8 : i32 to vector<1x1x256xi32>
    %6 = arith.cmpi ne, %4, %5 : vector<1x1x256xi32>
    %c1_i32 = arith.constant 1 : i32
    %7 = tpu.dynamic_rotate %0 by %c1_i32 dim 2 : vector<1x2x256xf32>, i32 -> vector<1x2x256xf32>
    %cst = arith.constant 0.000000e+00 : f32
    %8 = vector.shape_cast %3 : vector<1x1x256xi1> to vector<1x1x256xi1>
    %9 = vector.broadcast %8 : vector<1x1x256xi1> to vector<1x2x256xi1>
    %10 = vector.broadcast %cst : f32 to vector<1x2x256xf32>
    %11 = arith.select %9, %7, %10 : vector<1x2x256xi1>, vector<1x2x256xf32>
    %c16_i32 = arith.constant 16 : i32
    %12 = tpu.dynamic_rotate %0 by %c16_i32 dim 2 : vector<1x2x256xf32>, i32 -> vector<1x2x256xf32>
    %cst_9 = arith.constant 0.000000e+00 : f32
    %13 = vector.shape_cast %6 : vector<1x1x256xi1> to vector<1x1x256xi1>
    %14 = vector.broadcast %13 : vector<1x1x256xi1> to vector<1x2x256xi1>
    %15 = vector.broadcast %cst_9 : f32 to vector<1x2x256xf32>
    %16 = arith.select %14, %12, %15 : vector<1x2x256xi1>, vector<1x2x256xf32>
    %17 = arith.subf %11, %0 : vector<1x2x256xf32>
    %18 = arith.subf %16, %0 : vector<1x2x256xf32>
    %19 = math.absf %17 : vector<1x2x256xf32>
    %20 = math.absf %18 : vector<1x2x256xf32>
    %21 = arith.addf %19, %20 : vector<1x2x256xf32>
    %c0_10 = arith.constant 0 : index
    %c0_11 = arith.constant 0 : index
    %c0_12 = arith.constant 0 : index
    %22 = vector.load %arg4[%c0_10, %c0_11, %c0_12] : memref<1x2x256xf32, #tpu.memory_space<vmem>>, vector<1x2x256xf32>
    tpu.vector_store %arg4[%c0_10, %c0_11, %c0_12], %21 {strides = array<i32>} : memref<1x2x256xf32, #tpu.memory_space<vmem>>, vector<1x2x256xf32>,
    return
  }
  func.func @transform_0(%arg0: i32) -> (i32, i32, i32) {
    %c0_i32 = arith.constant 0 : i32
    %c0_i32_0 = arith.constant 0 : i32
    %c0_i32_1 = arith.constant 0 : i32
    return %arg0, %c0_i32, %c0_i32_0 : i32, i32, i32
  }
  func.func @transform_1(%arg0: i32) -> (i32, i32, i32) {
    %c0_i32 = arith.constant 0 : i32
    %c0_i32_0 = arith.constant 0 : i32
    %c0_i32_1 = arith.constant 0 : i32
    %c0_i32_2 = arith.constant 0 : i32
    return %c0_i32, %c0_i32_0, %c0_i32_1 : i32, i32, i32
  }
  func.func @transform_2(%arg0: i32) -> (i32, i32, i32) {
    %c0_i32 = arith.constant 0 : i32
    %c0_i32_0 = arith.constant 0 : i32
    %c0_i32_1 = arith.constant 0 : i32
    %c0_i32_2 = arith.constant 0 : i32
    return %c0_i32, %c0_i32_0, %c0_i32_1 : i32, i32, i32
  }
  func.func @transform_3(%arg0: i32) -> (i32, i32, i32) {
    %c0_i32 = arith.constant 0 : i32
    %c0_i32_0 = arith.constant 0 : i32
    %c0_i32_1 = arith.constant 0 : i32
    return %arg0, %c0_i32, %c0_i32_0 : i32, i32, i32
  }
}

</mosaic_0001>

<bundles_post_ra>
// kernel: tpu_custom_call.1
= control target key start
LH: loop header
LB: loop body
LE: loop exit
PB: predicated region body
PF: predicated region fallthrough
CT: control target
= control target key end

     0   :  { %8 = vsyncpa [#allocation3], 0  ;;  %s823_s0 = inlined_call_operand.hbm [shape: f32[4,2,256], index: 0, kind: input, shape index: {}]   ;;  %s824_s1 = inlined_call_operand.hbm [shape: s32[1,1,256], index: 1, kind: input, shape index: {}]   ;;  %s825_s2 = inlined_call_operand.hbm [shape: s32[1,1,256], index: 2, kind: input, shape index: {}]   ;;  %s826_s3 = inlined_call_operand.hbm [shape: f32[4,2,256], index: 3, kind: output, shape index: {}]  }
   0x1   :  { %10 = vsyncpa [#allocation3 + $0x1], 0 }
   0x2   :  { %11 = vsyncpa [#allocation6], 0 }
   0x3   :  { %12 = vsyncpa [#allocation4], 0 }
   0x4   :  { %14 = vsyncpa [#allocation4 + $0x1], 0  ;;  %s674_s12 = smov 0   ;;  %s676_s13 = smov 0  }
   0x5   :  { %s678_s14 = smov 0   ;;  %s680_s15 = smov 0  }
   0x6 LB: > { %s695_s16 = sadd.s32 4294967295, %s647_s15   ;;  %s397_s17 = sadd.s32 4294967294, %s647_s15   ;;  %s647_s15 = sphi %s680_s15, %s837_s15   ;;  %s643_s14 = sphi %s678_s14, %s836_s14   ;;  %s639_s13 = sphi %s676_s13, %s835_s13   ;;  %s635_s12 = sphi %s674_s12, %s834_s12  }
   0x7   : > { %p40_p0 = scmp.ne.s32.totalorder %s639_s13, %s635_s12  ;;  %p41_p1 = scmp.eq.s32.totalorder %s695_s16, 0 }
   0x8   : > { %p106_p2 = scmp.eq.s32.totalorder %s695_s16, 3  ;;  %p112_p3 = scmp.eq.s32.totalorder %s397_s17, 3 }
   0x9   : > { %p704_p4 = por %p41_p1, %p40_p0  ;;  %p398_p5 = scmp.ge.s32.totalorder %s647_s15, 1 }
   0xa   : > { %p709_p6 = por %p112_p3, %p40_p0  ;;  %p119_p7 = scmp.lt.s32.totalorder %s647_s15, 5 }
   0xb   : > { %s131_s22 = sshll.u32 %s824_s1, 4  ;;  %s649_s24 = smov [#allocation5]   ;;  %s132_s22 = int_to_ptr.hbm [resolvable:$true] %s131_s22 }
   0xc   : > { %p717_p8 = pnand %p398_p5, %p119_p7  ;;  %s133_s25 = sshll.u32 %s649_s24, 4  ;;  %s134_s25 = int_to_ptr.vmem [resolvable:$true] %s133_s25 }
   0xd   : > { %s143_s28 = sshll.u32 %s825_s2, 4  ;;  %s650_s29 = smov [#allocation7]   ;;  %s144_s28 = int_to_ptr.hbm [resolvable:$true] %s143_s28 }
   0xe   : > { %p429_p9 = pneg %p717_p8  ;;  %s145_s30 = sshll.u32 %s650_s29, 4  ;;  %s146_s30 = int_to_ptr.vmem [resolvable:$true] %s145_s30 }
   0xf   : > { %s729_s4 = sadd.s32 1, %s647_s15   ;;  %s27_s5 = sadd.s32 1, %s643_s14 }
  0x10   : > { %p430_p10 = pnand %p429_p9, %p41_p1  ;;  %s24_s6 = ssub.s32 %s647_s15, %s729_s4 }
  0x11   : > { %p34_p11 = scmp.ne.s32.totalorder %s643_s14, %s639_s13  ;;  %p25_p12 = scmp.eq.s32.totalorder %s24_s6, 0 }
  0x12   : > { %432 = dma.hbm_to_vmem [thread:$0]  (!%p430_p10), %s132_s22, 32, %s134_s25, [#allocation6]  }
  0x13   : > { %435 = dma.hbm_to_vmem [thread:$0]  (!%p430_p10), %s144_s28, 32, %s146_s30, [#allocation6]  }
  0x14   : > { %p35_p13 = scmp.eq.s32.totalorder %s647_s15, 0  ;;  %p739_p0 = por %p106_p2, %p34_p11 }
  0x15   : > { %p446_p3 = scmp.lt.s32.totalorder %s647_s15, 4  ;;  %s156_s9 = sand.u32 1, %s643_s14  }
  0x16   : > { %s745_s8 = scalar_select %p25_p12, %s643_s14, %s27_s5  }
  0x17   : > { %p36_p5 = por %p35_p13, %p34_p11  ;;  %s402_s10 = sshll.u32 %s156_s9, 2 }
  0x18   : > { %s415_s11 = sshll.u32 %s647_s15, 2  ;;  %s160_s22 = scalar_lea.vmem [#allocation2], %s402_s10 }
  0x19   : > { %s165_s21 = scalar_lea.hbm %s823_s0, %s415_s11  ;;  %s169_s24 = sshll.u32 %s160_s22, 4  ;;  %s170_s24 = int_to_ptr.vmem [resolvable:$true] %s169_s24 }
  0x1a   : > { %s167_s25 = sshll.u32 %s165_s21, 4  ;;  %p752_p2 = pnand %p446_p3, %p36_p5  ;;  %s168_s25 = int_to_ptr.hbm [resolvable:$true] %s167_s25 }
  0x1b   : > { %s157_s27 = scalar_lea.sflag [#allocation3], %s156_s9  ;;  %s547_s28 = sshra.s32 %s168_s25, 4  ;;  %s548_s28 = int_to_ptr.hbm [resolvable:$true] %s547_s28 }
  0x1c   : > { %s549_s29 = scalar_lea.hbm %s548_s28, 4  ;;  %p551_p9 = pneg %p752_p2 }
  0x1d   : > { %p550_p7 = scmp.ne.s32.totalorder %s548_s28, %s549_s29  ;;  %s554_s6 = scalar_lea.hbm %s823_s0, 16 }
  0x1e   : > { %p555_p12 = scmp.lt.s32.totalorder %s548_s28, %s823_s0  ;;  %p556_p13 = scmp.lt.s32.totalorder %s554_s6, %s549_s29 }
  0x1f   : > { %p552_p10 = pnand %p551_p9, %p550_p7 }
  0x20   : > { %p557_p3 = por %p556_p13, %p555_p12 }
  0x21   : > { %p553_p11 = pneg %p552_p10 }
  0x23   : > { %p558_p5 = pnand %p557_p3, %p553_p11 }
  0x25   : > { %561 = shalt.err (!%p558_p5)
}
  0x26   : > { %439 = dma.hbm_to_vmem [thread:$0]  (!%p752_p2), %s168_s25, 64, %s170_s24, %s157_s27  }
  0x27   : > { %178 = sbr.rel (%p717_p8) target bundleno = 201 (0xc9), region = 32  ;;  %s769_s9 = sand.u32 (!%p717_p8), 1, %s639_s13  }
  0x28   : > { %s406_s17 = sshll.u32 (!%p717_p8), %s769_s9, 2  ;;  %s181_s20 = scalar_lea.sflag (!%p717_p8), [#allocation3], %s769_s9 }
  0x29   : > { %s184_s21 = scalar_lea.vmem (!%p717_p8), [#allocation2], %s406_s17 }
  0x2c   : > { %622 = dma.done.wait (%p704_p4), %s181_s20, 64  }
  0x2d   : > { %624 = vsyncadd (%p704_p4), %s181_s20, 4294967232 }
  0x2e   : > { %626 = dma.done.wait (%p41_p1), [#allocation6], 64  }
  0x2f   : > { %628 = vsyncadd (%p41_p1), [#allocation6], 4294967232  ;;  %v218_v0 = vld [vmem:[%s184_s21] sm:$0xf]  ;;  %s651_s23 = smov 1   ;;  %s652_s22 = smov 16   ;;  %v233_v9 = vlaneseq }
  0x30   : > { %224 = vst [vmem:[#allocation1] ss:$4 sm:$0xff] %v218_v0  ;;  %v219_v7 = vld [vmem:[#allocation5] sm:$0x3]  ;;  %v221_v10 = vld [vmem:[#allocation7] sm:$0x3] }
  0x31   : > { %vm220_vm0 = vcmp.ne.s32.totalorder %v219_v7, 0  ;;  %v234_v11 = vand.u32 127, %v233_v9  ;;  %v653_v12 = vmov 0   ;;  %vm222_vm1 = vcmp.ne.s32.totalorder %v221_v10, 0  ;;  %s416_s18 = sshll.u32 %s695_s16, 2  ;;  %s217_s27 = scalar_lea.vmem [#allocation8], %s406_s17 }
  0x32   : > { %v238_v13 = vsel %vm220_vm0, 1, %v653_v12  ;;  %v257_v17 = vsel %vm222_vm1, 1, %v653_v12  ;;  %s303_s26 = scalar_lea.hbm %s826_s3, %s416_s18  ;;  %s305_s28 = sshll.u32 %s217_s27, 4  ;;  %vm287_vm8 = vcmask 1041408   ;;  %s306_s28 = int_to_ptr.vmem [resolvable:$true] %s305_s28 }
  0x33   : > { %v240_v14 = vperm.slane %v238_v13, 1  ;;  %vm235_vm2 = vcmp.lt.s32.totalorder %v234_v11, 1  ;;  %v239_v18 = vperm.slane %v238_v13, 0  ;;  %v258_v20 = vperm.slane %v257_v17, 0  ;;  %s307_s16 = sshll.u32 %s303_s26, 4  ;;  %s292_s29 = scalar_lea.sflag [#allocation4], %s769_s9  ;;  %s308_s16 = int_to_ptr.hbm [resolvable:$true] %s307_s16 }
  0x34   : > { %v259_v21 = vperm.slane %v257_v17, 1  ;;  %vm254_vm5 = vcmp.lt.s32.totalorder %v234_v11, 16  ;;  %s591_s30 = sshra.s32 %s308_s16, 4  ;;  %s597_s11 = scalar_lea.hbm %s826_s3, 16  ;;  %s592_s30 = int_to_ptr.hbm [resolvable:$true] %s591_s30 }
  0x35   : > { %vm242_vm3 = vcmp.eq.s32.totalorder %v240_v14, 1  ;;  %vm783_vm4 = vcmp.eq.s32.totalorder %v239_v18, 1  ;;  %vm260_vm6 = vcmp.eq.s32.totalorder %v258_v20, 1  ;;  %s593_s5 = scalar_lea.hbm %s592_s30, 4  ;;  %p598_p2 = scmp.lt.s32.totalorder %s592_s30, %s826_s3 }
  0x36   : > { %vm261_vm7 = vcmp.eq.s32.totalorder %v259_v21, 1  ;;  %p594_p1 = scmp.ne.s32.totalorder %s592_s30, %s593_s5  ;;  %p599_p7 = scmp.lt.s32.totalorder %s597_s11, %s593_s5 }
  0x37   : > { %v225_v1 = vld.sshfl [vmem:[#allocation1] sm:$0xff pattern:$0x73625140]  ;;  %v226_v2 = vld.sshfl [vmem:[#allocation1 + $0x8] sm:$0xff pattern:$0x73625140] }
  0x38   : > { %229 = vrot.lane.b32.xlu0 %v225_v1, %s651_s23  ;;  %245 = vst [vmem:[#allocation1] ss:$4 sm:$0xff] %v218_v0  ;;  %p595_p4 = pnand %p594_p1, %p739_p0  ;;  %p600_p9 = por %p599_p7, %p598_p2 }
  0x3a   : > { %p596_p8 = pneg %p595_p4 }
  0x3c   : > { %p601_p10 = pnand %p600_p9, %p596_p8 }
  0x3f   : > { %v246_v3 = vld.sshfl [vmem:[#allocation1] sm:$0xff pattern:$0x73625140]  ;;  %v247_v4 = vld.sshfl [vmem:[#allocation1 + $0x8] sm:$0xff pattern:$0x73625140] }
  0x40   : > { %231 = vrot.lane.b32.xlu0 %v226_v2, %s651_s23  ;;  %250 = vrot.lane.b32.xlu1 %v246_v3, %s652_s22  ;;  %264 = vst [vmem:[#allocation1] ss:$4 sm:$0xff] %v218_v0 }
  0x47   : > { %v265_v5 = vld.sshfl [vmem:[#allocation1] sm:$0xff pattern:$0x73625140]  ;;  %v266_v6 = vld.sshfl [vmem:[#allocation1 + $0x8] sm:$0xff pattern:$0x73625140] }
  0x48   : > { %252 = vrot.lane.b32.xlu1 %v247_v4, %s652_s22  ;;  %271 = vst [vmem:[#allocation1] ss:$4 sm:$0xff] %v218_v0 }
  0x4f   : > { %v272_v25 = vld.sshfl [vmem:[#allocation1] sm:$0xff pattern:$0x73625140]  ;;  %v273_v28 = vld.sshfl [vmem:[#allocation1 + $0x8] sm:$0xff pattern:$0x73625140] }
  0xaa   : > { %v230_v8 = vpop.permute.xlu0 %229 }
  0xb2   : > { %v232_v15 = vpop.permute.xlu0 %231  ;;  %v251_v16 = vpop.permute.xlu1 %250 }
  0xb3   : > { %v236_v19 = vsel %vm235_vm2, %v230_v8, %v232_v15  ;;  %v237_v23 = vsel %vm235_vm2, %v232_v15, %v230_v8 }
  0xb4   : > { %v244_v24 = vsel %vm242_vm3, %v236_v19, 0.0  ;;  %v243_v26 = vsel %vm783_vm4, %v237_v23, 0.0 }
  0xb5   : > { %v270_v29 = vsub.f32 %v244_v24, %v266_v6  ;;  %v269_v34 = vsub.f32 %v243_v26, %v265_v5 }
  0xb7   : > { %v279_v37 = vand.u32 2147483647, %v270_v29  ;;  %v278_v40 = vand.u32 2147483647, %v269_v34 }
  0xba   : > { %v253_v27 = vpop.permute.xlu1 %252 }
  0xbb   : > { %v255_v30 = vsel %vm254_vm5, %v251_v16, %v253_v27  ;;  %v256_v31 = vsel %vm254_vm5, %v253_v27, %v251_v16 }
  0xbc   : > { %v262_v32 = vsel %vm260_vm6, %v256_v31, 0.0  ;;  %v263_v33 = vsel %vm261_vm7, %v255_v30, 0.0 }
  0xbd   : > { %v276_v35 = vsub.f32 %v262_v32, %v272_v25  ;;  %v277_v36 = vsub.f32 %v263_v33, %v273_v28 }
  0xbf   : > { %v280_v38 = vand.u32 2147483647, %v276_v35  ;;  %v281_v39 = vand.u32 2147483647, %v277_v36 }
  0xc1   : > { %v283_v41 = vadd.f32 %v281_v39, %v279_v37  ;;  %v282_v42 = vadd.f32 %v280_v38, %v278_v40 }
  0xc3   : > { %v286_v43 = vrot.slane %v283_v41, 6 }
  0xc5   : > { %v288_v44 = vsel %vm287_vm8, %v282_v42, %v286_v43 }
  0xc6   : > { %290 = vst [vmem:[%s217_s27] sm:$0xf] %v288_v44 }
  0xc7   : > { %604 = shalt.err (!%p601_p10)
}
  0xc8   : > { %427 = dma.vmem_to_hbm [thread:$0]  (%p739_p0), %s306_s28, 64, %s308_s16, %s292_s29  }
  0xc9 PF: > { %p449_p11 = scmp.ge.s32.totalorder %s647_s15, 2  ;;  %s319_s9 = sand.u32 1, %s635_s12  }
  0xca   : > { %s320_s21 = scalar_lea.sflag [#allocation4], %s319_s9 }
  0xcb   : > { %p441_p12 = pnand %p449_p11, %p709_p6 }
  0xcd   : > { %p442_p13 = pneg %p441_p12 }
  0xcf   : > { %630 = dma.done.wait (%p442_p13), %s320_s21, 64  }
  0xd0   : > { %632 = vsyncadd (%p442_p13), %s320_s21, 4294967232  ;;  %p17_p3 = scmp.ge.s32.totalorder %s729_s4, 6   ;;  %s834_s12 = smov %s639_s13 }
  0xd1   : > { %s835_s13 = smov %s643_s14  ;;  %s836_s14 = smov %s745_s8 }
  0xd2   : > { %s837_s15 = smov %s729_s4  ;;  %19 = sbr.rel (!%p17_p3) target bundleno = 6 (0x6), region = 85 }
  0xd7   :  { %326 = vsyncpa [#allocation3], 1 }
  0xd8   :  { %328 = vsyncpa [#allocation3 + $0x1], 1 }
  0xd9   :  { %329 = vsyncpa [#allocation6], 1 }
  0xda   :  { %330 = vsyncpa [#allocation4], 1 }
  0xdb   :  { %332 = vsyncpa [#allocation4 + $0x1], 1 }

</bundles_post_ra>
